<compile_context>
chip_gen: v6e
topology: v6e:2x2x1
jax: 0.10.0
libtpu: 0.0.40
codegen_flags: <defaults>
</compile_context>

<pallas_src>
import functools

import jax
import jax.numpy as jnp
from jax import lax
from jax.experimental import pallas as pl
from jax.experimental.pallas import tpu as pltpu


def _round_up(x, m):
    return (x + m - 1) // m * m


# --------------------------------- kernel -----------------------------------


def tcn_block_kernel(*refs, K, C_out_p, L, L_p, dilation, pad, halo,
                     dot_dtype, fuse_residual, per_tap):
    """One lane tile (a group of whole, lane-padded sequences) per grid step.

    Ref layouts (lane c = b*L_p + t within the tile):
      x    : (C_in_p, LANE)                           dot_dtype
      lhs1 : (rows1, K*C_in_p)  or (K, rows1, C_in_p) dot_dtype
             rows1 = 2*C_out_p when the 1x1 residual is fused, else C_out_p
      lhs2 : (C_out_p, K*C_out_p) or (K, C_out_p, C_out_p)
      wd   : (C_out_p, C_in_p)   (only when residual is NOT fused)
      b*   : (*, 1) f32
      out  : (C_out_p, LANE) f32, lane-dense
    """
    if fuse_residual:
        x_ref, lhs1_ref, lhs2_ref, b1_ref, b2_ref, out_ref = refs
        wd_ref = bd_ref = None
    else:
        x_ref, lhs1_ref, lhs2_ref, wd_ref, b1_ref, bd_ref, b2_ref, out_ref = refs

    LANE = x_ref.shape[-1]

    # Position of every lane inside its (padded) sequence.  The per-offset
    # validity masks are computed ONCE and shared by conv1 and conv2; they
    # zero taps that would cross a sequence boundary (which also implements
    # the conv zero-padding) or read the [L, L_p) lane-padding region.
    lane_t = lax.broadcasted_iota(jnp.int32, (1, LANE), 1) % L_p
    offsets = [k * dilation - pad for k in range(K)]
    valid = {off: (lane_t + off >= 0) & (lane_t + off < L)
             for off in offsets if off != 0}

    def taps(v):
        """K lane-shifted, edge-masked copies of v, each (C, LANE)."""
        zero = jnp.zeros((v.shape[0], halo), v.dtype)
        vh = jnp.concatenate([zero, v, zero], axis=1)   # 128-aligned concat
        out = []
        for k in range(K):
            off = offsets[k]
            if off == 0:
                out.append(v)                           # centre tap, no shift
            else:
                shifted = vh[:, halo + off:halo + off + LANE]  # static slice
                out.append(jnp.where(valid[off], shifted,
                                     jnp.zeros_like(shifted)))
        return out

    def conv(lhs_ref, v):
        """Dilated conv along the lane axis; f32 accumulation on the MXU."""
        ts = taps(v)
        if per_tap:
            # Large C: each tap already fills the MXU contraction; accumulate
            # per tap instead of materialising the K-wide im2col block.
            acc = jnp.dot(lhs_ref[0], ts[0], preferred_element_type=jnp.float32)
            for k in range(1, K):
                acc = acc + jnp.dot(lhs_ref[k], ts[k],
                                    preferred_element_type=jnp.float32)
            return acc
        # Small C: one MXU push with contraction depth K*C.
        cols = jnp.concatenate(ts, axis=0)              # (K*C, LANE)
        return jnp.dot(lhs_ref[...], cols, preferred_element_type=jnp.float32)

    x = x_ref[...]

    pre1 = conv(lhs1_ref, x)
    if fuse_residual:
        pre1 = pre1 + b1_ref[...]
        h1 = jnp.maximum(pre1[:C_out_p, :], 0.0)   # conv1 -> ReLU
        res = pre1[C_out_p:, :]                    # fused 1x1 downsample + bias
    else:
        h1 = jnp.maximum(pre1 + b1_ref[...], 0.0)
        res = jnp.dot(wd_ref[...], x,
                      preferred_element_type=jnp.float32) + bd_ref[...]
    # Dropout(p) is identity in eval mode.
    # TODO(synk): training-mode dropout (pltpu.prng_seed / prng_random_bits
    # mask) is not implemented.

    h2 = jnp.maximum(conv(lhs2_ref, h1.astype(dot_dtype)) + b2_ref[...], 0.0)
    out_ref[...] = jnp.maximum(h2 + res, 0.0)      # residual add + final ReLU


# ----------------------- one-time parameter packing -------------------------


def pack_tcn_params(w1, b1, w2, b2, wd, bd, *, dilation, pad,
                    dot_dtype=jnp.float32, fuse_residual=None, per_tap=None):
    """Pack effective (weight-normed) weights once, outside the step path.

    w1: (C_out, C_in, K)  conv1 (weight norm already applied)
    w2: (C_out, C_out, K) conv2
    wd: (C_out, C_in) 1x1 downsample or None (identity residual, C_in==C_out)
    """
    C_out, C_in, K = w1.shape
    if wd is None:
        assert C_in == C_out, "identity residual needs C_in == C_out"
        wd = jnp.eye(C_out, dtype=w1.dtype)
        bd = jnp.zeros((C_out,), w1.dtype)

    dot_dtype = jnp.dtype(dot_dtype)
    sub = 8 if dot_dtype.itemsize == 4 else 16       # sublane tile (f32 / bf16)
    C_in_p = _round_up(C_in, sub)
    C_out_p = _round_up(C_out, sub)

    center = pad // dilation
    center_ok = (0 <= center < K) and center * dilation == pad
    if per_tap is None:
        per_tap = C_in_p >= 128          # taps already fill the MXU contraction
    if fuse_residual is None:
        # Fusing the 1x1 residual into conv1 only pays while per-matmul
        # fill/drain dominates (tiny contraction depth).
        fuse_residual = center_ok and (K * C_in_p <= 512)
    if fuse_residual and not center_ok:
        raise ValueError("residual fusion needs an unshifted centre tap "
                         "(pad % dilation == 0 and pad // dilation < K)")

    def pad_bias(v):
        return jnp.pad(v.astype(jnp.float32),
                       (0, C_out_p - C_out)).reshape(C_out_p, 1)

    w1p = jnp.pad(w1, ((0, C_out_p - C_out), (0, C_in_p - C_in), (0, 0)))
    w2p = jnp.pad(w2, ((0, C_out_p - C_out), (0, C_out_p - C_out), (0, 0)))
    wdp = jnp.pad(wd, ((0, C_out_p - C_out), (0, C_in_p - C_in)))

    def pack_w(w):  # (rows, C, K) -> (K, rows, C) [per-tap] or (rows, K*C)
        rows, C, _ = w.shape
        if per_tap:
            return jnp.transpose(w, (2, 0, 1)).astype(dot_dtype)
        return jnp.transpose(w, (0, 2, 1)).reshape(rows, K * C).astype(dot_dtype)

    params = {}
    if fuse_residual:
        # 1x1 residual as extra LHS rows, weights living in the centre tap.
        down = jnp.zeros((C_out_p, C_in_p, K), w1p.dtype).at[:, :, center].set(wdp)
        params["lhs1"] = pack_w(jnp.concatenate([w1p, down], axis=0))
        params["bias1"] = jnp.concatenate([pad_bias(b1), pad_bias(bd)], axis=0)
        params["wd"] = None
        params["bd"] = None
    else:
        params["lhs1"] = pack_w(w1p)
        params["bias1"] = pad_bias(b1)
        params["wd"] = wdp.astype(dot_dtype)
        params["bd"] = pad_bias(bd)
    params["lhs2"] = pack_w(w2p)
    params["bias2"] = pad_bias(b2)
    params["cfg"] = dict(K=K, dilation=dilation, pad=pad, C_in=C_in,
                         C_out=C_out, C_in_p=C_in_p, C_out_p=C_out_p,
                         dot_dtype=dot_dtype, fuse_residual=bool(fuse_residual),
                         per_tap=bool(per_tap))
    return params


# ------------------------------ forward pass --------------------------------


def _per_lane_bytes(C_in_p, C_out_p, K, dot_bytes):
    # Rough VMEM bytes per lane: double-buffered in/out tiles, halo copies,
    # tap temporaries of both convs, and the f32 activation temporaries.
    return (2 * C_in_p * dot_bytes + 2 * C_out_p * 4
            + (K + 1) * C_in_p * dot_bytes + (K + 1) * C_out_p * dot_bytes
            + 6 * C_out_p * 4)


def tcn_block_forward(x, params, *, seqs_per_tile=None,
                      vmem_budget_bytes=32 * 1024 * 1024):
    """x: (N, C_in, L) f32 -> (N, C_out, L) f32 (eval-mode TCN block)."""
    cfg = params["cfg"]
    K, dilation, pad = cfg["K"], cfg["dilation"], cfg["pad"]
    C_in, C_out = cfg["C_in"], cfg["C_out"]
    C_in_p, C_out_p = cfg["C_in_p"], cfg["C_out_p"]
    dot_dtype = cfg["dot_dtype"]
    fuse = cfg["fuse_residual"]

    N, C_in_x, L = x.shape
    assert C_in_x == C_in
    L_p = _round_up(L, 128)                    # whole, lane-padded sequences
    halo = _round_up(max(pad, (K - 1) * dilation - pad, 1), 128)

    per_lane = _per_lane_bytes(C_in_p, C_out_p, K, dot_dtype.itemsize)
    if seqs_per_tile is None:
        lanes = max(128, vmem_budget_bytes // per_lane)
        seqs_per_tile = int(max(1, min(N, lanes // L_p)))
    N_p = _round_up(N, seqs_per_tile)
    T = seqs_per_tile * L_p                    # lanes per tile (multiple of 128)
    grid = (N_p // seqs_per_tile,)

    # Fold batch onto the lane axis: lane c = b * L_p + t.
    xt = jnp.transpose(x, (1, 0, 2))                              # (C_in, N, L)
    xt = jnp.pad(xt, ((0, C_in_p - C_in), (0, N_p - N), (0, L_p - L)))
    x2d = xt.reshape(C_in_p, N_p * L_p).astype(dot_dtype)

    def const_map(ndim):
        return lambda i, _n=ndim: (0,) * _n    # weights stay VMEM-resident

    inputs = [x2d, params["lhs1"], params["lhs2"]]
    in_specs = [
        pl.BlockSpec((C_in_p, T), lambda i: (0, i)),
        pl.BlockSpec(params["lhs1"].shape, const_map(params["lhs1"].ndim)),
        pl.BlockSpec(params["lhs2"].shape, const_map(params["lhs2"].ndim)),
    ]
    if not fuse:
        inputs.append(params["wd"])
        in_specs.append(pl.BlockSpec(params["wd"].shape, const_map(2)))
    inputs.append(params["bias1"])
    in_specs.append(pl.BlockSpec(params["bias1"].shape, const_map(2)))
    if not fuse:
        inputs.append(params["bd"])
        in_specs.append(pl.BlockSpec(params["bd"].shape, const_map(2)))
    inputs.append(params["bias2"])
    in_specs.append(pl.BlockSpec(params["bias2"].shape, const_map(2)))

    weight_bytes = sum(int(a.size) * a.dtype.itemsize for a in inputs[1:])
    est = per_lane * T + 2 * weight_bytes
    vmem_limit = int(min(max(2 * est, 32 * 1024 * 1024), 48 * 1024 * 1024))

    kernel = functools.partial(
        tcn_block_kernel, K=K, C_out_p=C_out_p, L=L, L_p=L_p,
        dilation=dilation, pad=pad, halo=halo, dot_dtype=dot_dtype,
        fuse_residual=fuse, per_tap=cfg["per_tap"])

    out2d = pl.pallas_call(
        kernel,
        out_shape=jax.ShapeDtypeStruct((C_out_p, N_p * L_p), jnp.float32),
        grid=grid,
        in_specs=in_specs,
        out_specs=pl.BlockSpec((C_out_p, T), lambda i: (0, i)),
        compiler_params=pltpu.CompilerParams(
            dimension_semantics=("parallel",),   # v7x megacore splits the tiles
            vmem_limit_bytes=vmem_limit),
    )(*inputs)

    out = out2d.reshape(C_out_p, N_p, L_p)[:C_out, :N, :L]
    return jnp.transpose(out, (1, 0, 2))


# --------------------------- reference / main --------------------------------


def weight_norm_effective(v, g):
    # PyTorch weight_norm: W = g * v / ||v||, norm over all dims except dim 0.
    norm = jnp.sqrt(jnp.sum(v * v, axis=(1, 2), keepdims=True))
    return g * v / norm


def conv1d_ref(x, w, b, pad, dilation):
    out = lax.conv_general_dilated(
        x, w, window_strides=(1,), padding=[(pad, pad)],
        rhs_dilation=(dilation,), dimension_numbers=("NCH", "OIH", "NCH"))
    return out + b[None, :, None]


def tcn_block_ref(x, w1, b1, w2, b2, wd, bd, pad, dilation):
    h = jax.nn.relu(conv1d_ref(x, w1, b1, pad, dilation))
    h = jax.nn.relu(conv1d_ref(h, w2, b2, pad, dilation))
    res = conv1d_ref(x, wd, bd, 0, 1)
    return jax.nn.relu(h + res)


if __name__ == "__main__":
    # Small shapes: batch=4, input_channels=4, output_channels=8, seq_len=16.
    N, C_in, C_out, L = 4, 4, 8, 16
    K, dilation, pad = 3, 1, 1          # stride fixed at 1 (residual add)

    key = jax.random.PRNGKey(0)
    kx, kv1, kb1, kv2, kb2, kwd, kbd = jax.random.split(key, 7)

    x = jax.random.normal(kx, (N, C_in, L), dtype=jnp.float32)

    # conv1: weight_norm(Conv1d(C_in, C_out, K));  PyTorch init: g = ||v||.
    v1 = jax.random.normal(kv1, (C_out, C_in, K), dtype=jnp.float32) * 0.2
    g1 = jnp.sqrt(jnp.sum(v1 * v1, axis=(1, 2), keepdims=True))
    b1 = jax.random.normal(kb1, (C_out,), dtype=jnp.float32) * 0.1
    w1 = weight_norm_effective(v1, g1)

    # conv2: weight_norm(Conv1d(C_out, C_out, K))
    v2 = jax.random.normal(kv2, (C_out, C_out, K), dtype=jnp.float32) * 0.2
    g2 = jnp.sqrt(jnp.sum(v2 * v2, axis=(1, 2), keepdims=True))
    b2 = jax.random.normal(kb2, (C_out,), dtype=jnp.float32) * 0.1
    w2 = weight_norm_effective(v2, g2)

    # downsample: Conv1d(C_in, C_out, 1) (present because C_in != C_out)
    wd = jax.random.normal(kwd, (C_out, C_in), dtype=jnp.float32) * 0.2
    bd = jax.random.normal(kbd, (C_out,), dtype=jnp.float32) * 0.1

    ref = tcn_block_ref(x, w1, b1, w2, b2, wd[:, :, None], bd, pad, dilation)

    # (a) default small-C config: fused residual + im2col, f32 MXU operands.
    # seqs_per_tile=2 is only to exercise a multi-step pipelined grid at toy
    # sizes; leave None to auto-size the tile from the VMEM budget.
    params = pack_tcn_params(w1, b1, w2, b2, wd, bd, dilation=dilation, pad=pad)
    out = jax.block_until_ready(tcn_block_forward(x, params, seqs_per_tile=2))
    assert out.shape == (N, C_out, L)
    assert jnp.allclose(out, ref, atol=1e-4, rtol=1e-4), (
        f"fused/im2col max abs err = {jnp.max(jnp.abs(out - ref))}")

    # (b) large-C code path: per-tap MXU accumulation + un-fused residual.
    params_pt = pack_tcn_params(w1, b1, w2, b2, wd, bd, dilation=dilation,
                                pad=pad, fuse_residual=False, per_tap=True)
    out_pt = jax.block_until_ready(tcn_block_forward(x, params_pt))
    assert jnp.allclose(out_pt, ref, atol=1e-4, rtol=1e-4), (
        f"per-tap max abs err = {jnp.max(jnp.abs(out_pt - ref))}")

    # (c) bf16 MXU operands (f32 accumulation) -- the right choice on v6e/v7x.
    params_bf = pack_tcn_params(w1, b1, w2, b2, wd, bd, dilation=dilation,
                                pad=pad, dot_dtype=jnp.bfloat16)
    out_bf = jax.block_until_ready(
        tcn_block_forward(x, params_bf, seqs_per_tile=2))
    assert jnp.allclose(out_bf, ref, atol=5e-2, rtol=5e-2), (
        f"bf16 max abs err = {jnp.max(jnp.abs(out_bf - ref))}")

    print("KERNEL_OK")
</pallas_src>

<mosaic_0001>
module attributes {stable_mosaic.version = 11 : i64} {
  func.func @tcn_block_kernel(%arg0: i32, %arg1: memref<8x256xf32, #tpu.memory_space<vmem>>, %arg2: memref<16x24xf32, #tpu.memory_space<vmem>>, %arg3: memref<8x24xf32, #tpu.memory_space<vmem>>, %arg4: memref<16x1xf32, #tpu.memory_space<vmem>>, %arg5: memref<8x1xf32, #tpu.memory_space<vmem>>, %arg6: memref<8x256xf32, #tpu.memory_space<vmem>>) attributes {dimension_semantics = [#tpu.dimension_semantics<parallel>], iteration_bounds = array<i64: 2>, scalar_prefetch = 0 : i64, scratch_operands = 0 : i64, tpu.core_type = #tpu.core_type<tc>, window_params = [{transform_indices = @transform_0, window_bounds = array<i64: 8, 256>}, {pipeline_mode = #tpu.pipeline_mode<synchronous>, transform_indices = @transform_1, window_bounds = array<i64: 16, 24>}, {pipeline_mode = #tpu.pipeline_mode<synchronous>, transform_indices = @transform_2, window_bounds = array<i64: 8, 24>}, {pipeline_mode = #tpu.pipeline_mode<synchronous>, transform_indices = @transform_3, window_bounds = array<i64: 16, 1>}, {pipeline_mode = #tpu.pipeline_mode<synchronous>, transform_indices = @transform_4, window_bounds = array<i64: 8, 1>}, {transform_indices = @transform_5, window_bounds = array<i64: 8, 256>}]} {
    %0 = tpu.iota {dimensions = array<i32: 1>} : vector<1x256xi32>
    %c128_i32 = arith.constant 128 : i32
    %c0_i32 = arith.constant 0 : i32
    %1 = arith.cmpi eq, %c128_i32, %c0_i32 : i32
    %c1_i32 = arith.constant 1 : i32
    %2 = arith.select %1, %c1_i32, %c128_i32 : i32
    %3 = vector.broadcast %2 : i32 to vector<1x256xi32>
    %4 = arith.remsi %0, %3 : vector<1x256xi32>
    %c0_i32_0 = arith.constant 0 : i32
    %5 = vector.broadcast %c0_i32_0 : i32 to vector<1x256xi32>
    %6 = arith.cmpi ne, %4, %5 : vector<1x256xi32>
    %c0_i32_1 = arith.constant 0 : i32
    %7 = vector.broadcast %c0_i32_1 : i32 to vector<1x256xi32>
    %8 = arith.cmpi slt, %4, %7 : vector<1x256xi32>
    %c0_i32_2 = arith.constant 0 : i32
    %9 = arith.cmpi slt, %2, %c0_i32_2 : i32
    %10 = vector.broadcast %9 : i1 to vector<1x256xi1>
    %11 = vector.broadcast %10 : vector<1x256xi1> to vector<1x256xi1>
    %12 = arith.xori %8, %11 : vector<1x256xi1>
    %13 = arith.andi %12, %6 : vector<1x256xi1>
    %14 = vector.broadcast %2 : i32 to vector<1x256xi32>
    %15 = arith.addi %4, %14 : vector<1x256xi32>
    %16 = arith.select %13, %15, %4 : vector<1x256xi1>, vector<1x256xi32>
    %c-1_i32 = arith.constant -1 : i32
    %17 = vector.broadcast %c-1_i32 : i32 to vector<1x256xi32>
    %18 = arith.addi %16, %17 : vector<1x256xi32>
    %c0_i32_3 = arith.constant 0 : i32
    %19 = vector.broadcast %c0_i32_3 : i32 to vector<1x256xi32>
    %20 = arith.cmpi sge, %18, %19 : vector<1x256xi32>
    %c-1_i32_4 = arith.constant -1 : i32
    %21 = vector.broadcast %c-1_i32_4 : i32 to vector<1x256xi32>
    %22 = arith.addi %16, %21 : vector<1x256xi32>
    %c16_i32 = arith.constant 16 : i32
    %23 = vector.broadcast %c16_i32 : i32 to vector<1x256xi32>
    %24 = arith.cmpi slt, %22, %23 : vector<1x256xi32>
    %25 = arith.andi %20, %24 : vector<1x256xi1>
    %c1_i32_5 = arith.constant 1 : i32
    %26 = vector.broadcast %c1_i32_5 : i32 to vector<1x256xi32>
    %27 = arith.addi %16, %26 : vector<1x256xi32>
    %c0_i32_6 = arith.constant 0 : i32
    %28 = vector.broadcast %c0_i32_6 : i32 to vector<1x256xi32>
    %29 = arith.cmpi sge, %27, %28 : vector<1x256xi32>
    %c1_i32_7 = arith.constant 1 : i32
    %30 = vector.broadcast %c1_i32_7 : i32 to vector<1x256xi32>
    %31 = arith.addi %16, %30 : vector<1x256xi32>
    %c16_i32_8 = arith.constant 16 : i32
    %32 = vector.broadcast %c16_i32_8 : i32 to vector<1x256xi32>
    %33 = arith.cmpi slt, %31, %32 : vector<1x256xi32>
    %34 = arith.andi %29, %33 : vector<1x256xi1>
    %c0 = arith.constant 0 : index
    %c0_9 = arith.constant 0 : index
    %35 = vector.load %arg1[%c0, %c0_9] : memref<8x256xf32, #tpu.memory_space<vmem>>, vector<8x256xf32>
    %cst = arith.constant 0.000000e+00 : f32
    %36 = vector.broadcast %cst : f32 to vector<8x128xf32>
    %37 = tpu.concatenate %36, %35, %36 in 1 : vector<8x128xf32>, vector<8x256xf32>, vector<8x128xf32> -> vector<8x512xf32>
    %38 = vector.extract_strided_slice %37 {offsets = [0, 127], sizes = [8, 256], strides = [1, 1]} : vector<8x512xf32> to vector<8x256xf32>
    %cst_10 = arith.constant 0.000000e+00 : f32
    %39 = vector.broadcast %cst_10 : f32 to vector<8x256xf32>
    %40 = vector.shape_cast %25 : vector<1x256xi1> to vector<1x256xi1>
    %41 = vector.broadcast %40 : vector<1x256xi1> to vector<8x256xi1>
    %42 = arith.select %41, %38, %39 : vector<8x256xi1>, vector<8x256xf32>
    %43 = vector.extract_strided_slice %37 {offsets = [0, 129], sizes = [8, 256], strides = [1, 1]} : vector<8x512xf32> to vector<8x256xf32>
    %cst_11 = arith.constant 0.000000e+00 : f32
    %44 = vector.broadcast %cst_11 : f32 to vector<8x256xf32>
    %45 = vector.shape_cast %34 : vector<1x256xi1> to vector<1x256xi1>
    %46 = vector.broadcast %45 : vector<1x256xi1> to vector<8x256xi1>
    %47 = arith.select %46, %43, %44 : vector<8x256xi1>, vector<8x256xf32>
    %48 = tpu.concatenate %42, %35, %47 in 0 : vector<8x256xf32>, vector<8x256xf32>, vector<8x256xf32> -> vector<24x256xf32>
    %c0_12 = arith.constant 0 : index
    %c0_13 = arith.constant 0 : index
    %49 = vector.load %arg2[%c0_12, %c0_13] : memref<16x24xf32, #tpu.memory_space<vmem>>, vector<16x24xf32>
    %cst_14 = arith.constant dense<0.000000e+00> : vector<16x256xf32>
    %50 = tpu.matmul %49, %48, %cst_14 {dimension_numbers = #tpu.dot_dimension_numbers<[1], [0], [0], [1], [0, 0, 1, 1], [], []>} : vector<16x24xf32>, vector<24x256xf32>, vector<16x256xf32> -> vector<16x256xf32>
    %c0_15 = arith.constant 0 : index
    %c0_16 = arith.constant 0 : index
    %51 = vector.load %arg4[%c0_15, %c0_16] : memref<16x1xf32, #tpu.memory_space<vmem>>, vector<16x1xf32>
    %52 = vector.broadcast %51 : vector<16x1xf32> to vector<16x256xf32>
    %53 = arith.addf %50, %52 : vector<16x256xf32>
    %54 = vector.extract_strided_slice %53 {offsets = [0, 0], sizes = [8, 256], strides = [1, 1]} : vector<16x256xf32> to vector<8x256xf32>
    %cst_17 = arith.constant 0.000000e+00 : f32
    %55 = vector.broadcast %cst_17 : f32 to vector<8x256xf32>
    %56 = arith.maximumf %54, %55 : vector<8x256xf32>
    %57 = vector.extract_strided_slice %53 {offsets = [8, 0], sizes = [8, 256], strides = [1, 1]} : vector<16x256xf32> to vector<8x256xf32>
    %cst_18 = arith.constant 0.000000e+00 : f32
    %58 = vector.broadcast %cst_18 : f32 to vector<8x128xf32>
    %59 = tpu.concatenate %58, %56, %58 in 1 : vector<8x128xf32>, vector<8x256xf32>, vector<8x128xf32> -> vector<8x512xf32>
    %60 = vector.extract_strided_slice %59 {offsets = [0, 127], sizes = [8, 256], strides = [1, 1]} : vector<8x512xf32> to vector<8x256xf32>
    %cst_19 = arith.constant 0.000000e+00 : f32
    %61 = vector.broadcast %cst_19 : f32 to vector<8x256xf32>
    %62 = vector.shape_cast %25 : vector<1x256xi1> to vector<1x256xi1>
    %63 = vector.broadcast %62 : vector<1x256xi1> to vector<8x256xi1>
    %64 = arith.select %63, %60, %61 : vector<8x256xi1>, vector<8x256xf32>
    %65 = vector.extract_strided_slice %59 {offsets = [0, 129], sizes = [8, 256], strides = [1, 1]} : vector<8x512xf32> to vector<8x256xf32>
    %cst_20 = arith.constant 0.000000e+00 : f32
    %66 = vector.broadcast %cst_20 : f32 to vector<8x256xf32>
    %67 = vector.shape_cast %34 : vector<1x256xi1> to vector<1x256xi1>
    %68 = vector.broadcast %67 : vector<1x256xi1> to vector<8x256xi1>
    %69 = arith.select %68, %65, %66 : vector<8x256xi1>, vector<8x256xf32>
    %70 = tpu.concatenate %64, %56, %69 in 0 : vector<8x256xf32>, vector<8x256xf32>, vector<8x256xf32> -> vector<24x256xf32>
    %c0_21 = arith.constant 0 : index
    %c0_22 = arith.constant 0 : index
    %71 = vector.load %arg3[%c0_21, %c0_22] : memref<8x24xf32, #tpu.memory_space<vmem>>, vector<8x24xf32>
    %cst_23 = arith.constant dense<0.000000e+00> : vector<8x256xf32>
    %72 = tpu.matmul %71, %70, %cst_23 {dimension_numbers = #tpu.dot_dimension_numbers<[1], [0], [0], [1], [0, 0, 1, 1], [], []>} : vector<8x24xf32>, vector<24x256xf32>, vector<8x256xf32> -> vector<8x256xf32>
    %c0_24 = arith.constant 0 : index
    %c0_25 = arith.constant 0 : index
    %73 = vector.load %arg5[%c0_24, %c0_25] : memref<8x1xf32, #tpu.memory_space<vmem>>, vector<8x1xf32>
    %74 = vector.broadcast %73 : vector<8x1xf32> to vector<8x256xf32>
    %75 = arith.addf %72, %74 : vector<8x256xf32>
    %cst_26 = arith.constant 0.000000e+00 : f32
    %76 = vector.broadcast %cst_26 : f32 to vector<8x256xf32>
    %77 = arith.maximumf %75, %76 : vector<8x256xf32>
    %78 = arith.addf %77, %57 : vector<8x256xf32>
    %cst_27 = arith.constant 0.000000e+00 : f32
    %79 = vector.broadcast %cst_27 : f32 to vector<8x256xf32>
    %80 = arith.maximumf %78, %79 : vector<8x256xf32>
    %c0_28 = arith.constant 0 : index
    %c0_29 = arith.constant 0 : index
    %81 = vector.load %arg6[%c0_28, %c0_29] : memref<8x256xf32, #tpu.memory_space<vmem>>, vector<8x256xf32>
    tpu.vector_store %arg6[%c0_28, %c0_29], %80 {strides = array<i32>} : memref<8x256xf32, #tpu.memory_space<vmem>>, vector<8x256xf32>,
    return
  }
  func.func @transform_0(%arg0: i32) -> (i32, i32) {
    %c0_i32 = arith.constant 0 : i32
    %c0_i32_0 = arith.constant 0 : i32
    return %c0_i32, %arg0 : i32, i32
  }
  func.func @transform_1(%arg0: i32) -> (i32, i32) {
    %c0_i32 = arith.constant 0 : i32
    %c0_i32_0 = arith.constant 0 : i32
    %c0_i32_1 = arith.constant 0 : i32
    return %c0_i32, %c0_i32_0 : i32, i32
  }
  func.func @transform_2(%arg0: i32) -> (i32, i32) {
    %c0_i32 = arith.constant 0 : i32
    %c0_i32_0 = arith.constant 0 : i32
    %c0_i32_1 = arith.constant 0 : i32
    return %c0_i32, %c0_i32_0 : i32, i32
  }
  func.func @transform_3(%arg0: i32) -> (i32, i32) {
    %c0_i32 = arith.constant 0 : i32
    %c0_i32_0 = arith.constant 0 : i32
    %c0_i32_1 = arith.constant 0 : i32
    return %c0_i32, %c0_i32_0 : i32, i32
  }
  func.func @transform_4(%arg0: i32) -> (i32, i32) {
    %c0_i32 = arith.constant 0 : i32
    %c0_i32_0 = arith.constant 0 : i32
    %c0_i32_1 = arith.constant 0 : i32
    return %c0_i32, %c0_i32_0 : i32, i32
  }
  func.func @transform_5(%arg0: i32) -> (i32, i32) {
    %c0_i32 = arith.constant 0 : i32
    %c0_i32_0 = arith.constant 0 : i32
    return %c0_i32, %arg0 : i32, i32
  }
}

</mosaic_0001>

<bundles_post_ra>
// kernel: tpu_custom_call.1
= control target key start
LH: loop header
LB: loop body
LE: loop exit
PB: predicated region body
PF: predicated region fallthrough
CT: control target
= control target key end

     0   :  { %10 = vsyncpa [#allocation3], 0  ;;  %s1034_s0 = inlined_call_operand.hbm [shape: f32[8,512], index: 0, kind: input, shape index: {}]   ;;  %s1035_s1 = inlined_call_operand.vmem [shape: f32[16,24], index: 1, kind: input, shape index: {}]   ;;  %s1036_s2 = inlined_call_operand.vmem [shape: f32[8,24], index: 2, kind: input, shape index: {}]   ;;  %s1037_s3 = inlined_call_operand.vmem [shape: f32[16,1], index: 3, kind: input, shape index: {}]   ;;  %s1038_s4 = inlined_call_operand.vmem [shape: f32[8,1], index: 4, kind: input, shape index: {}]   ;;  %s1039_s5 = inlined_call_operand.hbm [shape: f32[8,512], index: 5, kind: output, shape index: {}]  }
   0x1   :  { %12 = vsyncpa [#allocation3 + $0x1], 0 }
   0x2   :  { %13 = vsyncpa [#allocation4], 0 }
   0x3   :  { %15 = vsyncpa [#allocation4 + $0x1], 0  ;;  %s830_s18 = smov 0   ;;  %s832_s19 = smov 0  }
   0x4   :  { %s834_s20 = smov 0   ;;  %s836_s21 = smov 0  }
   0x5 LB: > { %s851_s22 = sadd.s32 4294967295, %s792_s21   ;;  %s621_s23 = sadd.s32 4294967294, %s792_s21   ;;  %s792_s21 = sphi %s836_s21, %s1060_s21   ;;  %s788_s20 = sphi %s834_s20, %s1059_s20   ;;  %s784_s19 = sphi %s832_s19, %s1058_s19   ;;  %s780_s18 = sphi %s830_s18, %s1057_s18  }
   0x6   : > { %s855_s24 = sadd.s32 1, %s792_s21   ;;  %s28_s25 = sadd.s32 1, %s788_s20 }
   0x7   : > { %s25_s26 = ssub.s32 %s792_s21, %s855_s24  ;;  %p35_p0 = scmp.ne.s32.totalorder %s788_s20, %s784_s19 }
   0x8   : > { %p26_p1 = scmp.eq.s32.totalorder %s25_s26, 0  ;;  %p36_p2 = scmp.eq.s32.totalorder %s792_s21, 0 }
   0x9   : > { %p41_p3 = scmp.ne.s32.totalorder %s784_s19, %s780_s18  ;;  %p42_p4 = scmp.eq.s32.totalorder %s851_s22, 0 }
   0xa   : > { %s867_s27 = scalar_select %p26_p1, %s788_s20, %s28_s25  }
   0xb   : > { %p869_p5 = por %p36_p2, %p35_p0  ;;  %p873_p6 = por %p42_p4, %p41_p3 }
   0xc   : > { %p149_p7 = scmp.eq.s32.totalorder %s851_s22, 1  ;;  %p155_p8 = scmp.eq.s32.totalorder %s621_s23, 1 }
   0xd   : > { %s1043_s29 = scalar_select %p873_p6, 1, 0 }
   0xe   : > { %p660_p10 = scmp.lt.s32.totalorder %s792_s21, 2  ;;  %p880_p11 = por %p149_p7, %p35_p0 }
   0xf   : > { %p884_p12 = por %p155_p8, %p41_p3  ;;  %s187_s7 = sand.u32 1, %s788_s20  }
  0x10   : > { %s1044_s30 = scalar_select %p880_p11, 1, 0 }
  0x11   : > { %s1045_s6 = scalar_select %p884_p12, 1, 0 }
  0x12   : > { %s646_s8 = sshll.u32 %s792_s21, 8  ;;  %s624_s9 = sshll.u32 %s187_s7, 4 }
  0x13   : > { %s893_s12 = scalar_lea.hbm %s1034_s0, %s646_s8  ;;  %s191_s13 = scalar_lea.vmem [#allocation2], %s624_s9 }
  0x14   : > { %s199_s14 = sshll.u32 %s191_s13, 4  ;;  %p897_p13 = pnand %p660_p10, %p869_p5  ;;  %s901_s14 = int_to_ptr.vmem [resolvable:$true] %s199_s14 }
  0x15   : > { %s188_s16 = scalar_lea.sflag [#allocation3], %s187_s7  ;;  %s700_s17 = scalar_lea.hbm %s893_s12, 256 }
  0x16   : > { %p701_p2 = scmp.ne.s32.totalorder %s893_s12, %s700_s17  ;;  %p702_p3 = pneg %p897_p13 }
  0x17   : > { %s705_s26 = scalar_lea.hbm %s1034_s0, 512  ;;  %p706_p5 = scmp.lt.s32.totalorder %s893_s12, %s1034_s0 }
  0x18   : > { %p703_p4 = pnand %p702_p3, %p701_p2  ;;  %p707_p8 = scmp.lt.s32.totalorder %s705_s26, %s700_s17 }
  0x1a   : > { %p704_p7 = pneg %p703_p4  ;;  %p708_p10 = por %p707_p8, %p706_p5 }
  0x1c   : > { %p709_p9 = pnand %p708_p10, %p704_p7 }
  0x1e   : > { %712 = shalt.err (!%p709_p9)
}
  0x1f   : > { %s713_s7 = scalar_lea.vmem %s901_s14, 256  ;;  %s794_s9 = smov [#allocation2]  }
  0x20   : > { %p714_p0 = scmp.ne.s32.totalorder %s901_s14, %s713_s7  ;;  %s718_s10 = sshll.u32 %s794_s9, 4  ;;  %s719_s10 = int_to_ptr.vmem [resolvable:$false] %s718_s10 }
  0x21   : > { %s720_s11 = scalar_lea.vmem %s719_s10, 512  ;;  %p721_p4 = scmp.lt.s32.totalorder %s901_s14, %s719_s10 }
  0x22   : > { %p716_p1 = pnand %p714_p0, %p702_p3  ;;  %p722_p12 = scmp.lt.s32.totalorder %s720_s11, %s713_s7 }
  0x24   : > { %p717_p2 = pneg %p716_p1  ;;  %p723_p11 = por %p722_p12, %p721_p4 }
  0x26   : > { %p724_p6 = pnand %p723_p11, %p717_p2 }
  0x28   : > { %727 = shalt.err (!%p724_p6)
}
  0x29   : > { %655 = dma.hbm_to_vmem [thread:$0]  (!%p897_p13), %s893_s12, 256, %s901_s14, %s188_s16  }
  0x2a   : > { %p1047_p9 = scmp.lt.s32.totalorder %s792_s21, 3  ;;  %p1048_p7 = scmp.ge.s32.totalorder %s792_s21, 1 }
  0x2c   : > { %p205_p0 = pnand %p1048_p7, %p1047_p9 }
  0x2d   : > { %s928_s13 = sand.u32 (!%p205_p0), 1, %s784_s19   ;;  %p1049_p6 = scmp.ne.s32.totalorder (!%p205_p0), %s1043_s29, 0 }
  0x2e   : > { %208 = sbr.rel (%p205_p0) target bundleno = 720 (0x2d0), region = 40  ;;  %s628_s17 = sshll.u32 (!%p205_p0), %s928_s13, 4 }
  0x2f   : > { %s211_s23 = scalar_lea.sflag (!%p205_p0), [#allocation3], %s928_s13  ;;  %s214_s15 = scalar_lea.vmem (!%p205_p0), [#allocation2], %s628_s17 }
  0x33   : > { %771 = dma.done.wait (%p1049_p6), %s211_s23, 256  }
  0x34   : > { %773 = vsyncadd (%p1049_p6), %s211_s23, 4294967040  ;;  %v795_v0 = vmov 0.0   ;;  %s796_s12 = smov 127   ;;  %v797_v1 = vmov 0   ;;  %v287_v2 = vld [vmem:[%s214_s15 + $0x8] sm:$0xff]  ;;  %v286_v3 = vld [vmem:[%s214_s15] sm:$0xff]  ;;  %v243_v5 = vlaneseq }
  0x35   : > { %316 = vrot.lane.b32.xlu0 %v795_v0, %s796_s12  ;;  %410 = vmatprep.mubr.f32.mxu0 %v795_v0  ;;  %s798_s14 = smov 1   ;;  %v327_v4 = vld [vmem:[%s1037_s3] sm:$0xff]  ;;  %vm318_vm0 = vcmask 1039360   ;;  %vm301_vm5 = vcmask 7168   ;;  %vm339_vm10 = vcmask 195584   ;;  %v326_v30 = vld [vmem:[%s1035_s1 + $0x8] sm:$0xff] }
  0x36   : > { %521 = vmatprep.mubr.f32.mxu1 %v795_v0  ;;  %698 = vset.pattern.permute.xlu0 %v797_v1  ;;  %v244_v6 = vand.u32 127, %v243_v5  ;;  %v325_v24 = vld [vmem:[%s1035_s1] sm:$0xff]  ;;  %v328_v35 = vld [vmem:[%s1037_s3 + $0x8] sm:$0xff]  ;;  %s537_s28 = scalar_lea.sflag [#allocation4], %s928_s13  ;;  %p1054_p12 = scmp.ne.s32.totalorder %s1044_s30, 0 }
  0x37   : > { %699 = vset.pattern.permute.xlu1 %v797_v1  ;;  %v448_v33 = vld [vmem:[%s1038_s4] sm:$0xff] }
  0x38   : > { %312 = vrot.lane.b32.xlu1 %v286_v3, %s796_s12  ;;  %v245_v7 = vadd.s32 128, %v244_v6  ;;  %v278_v12 = vadd.s32 1, %v244_v6  ;;  %v270_v15 = vadd.s32 4294967295, %v244_v6  ;;  %v447_v43 = vld [vmem:[%s1036_s2] sm:$0xff] }
  0x39   : > { %314 = vrot.lane.b32.xlu0 %v287_v2, %s796_s12 }
  0x3a   : > { %v257_v8 = vand.u32 127, %v245_v7  ;;  %vm282_vm2 = vcmp.lt.s32.totalorder %v278_v12, 16  ;;  %vm272_vm7 = vcmp.ge.s32.totalorder %v270_v15, 0  ;;  %vm274_vm8 = vcmp.lt.s32.totalorder %v270_v15, 16 }
  0x3b   : > { %vm958_vm9 = vmand %vm272_vm7, %vm274_vm8 }
  0x3c   : > { %297 = vrot.lane.b32.xlu1 %v286_v3, %s798_s14  ;;  %v279_v10 = vadd.s32 1, %v257_v8  ;;  %v271_v11 = vadd.s32 4294967295, %v257_v8 }
  0x3d   : > { %299 = vrot.lane.b32.xlu0 %v287_v2, %s798_s14 }
  0x3e   : > { %vm283_vm1 = vcmp.lt.s32.totalorder %v279_v10, 16  ;;  %vm273_vm3 = vcmp.ge.s32.totalorder %v271_v11, 0  ;;  %vm275_vm4 = vcmp.lt.s32.totalorder %v271_v11, 16 }
  0x3f   : > { %vm951_vm6 = vmand %vm273_vm3, %vm275_vm4 }
  0x40   : > { %295 = vrot.lane.b32.xlu1 %v795_v0, %s798_s14 }
  0x41   : > { %331 = vperm.xlu0 %698, %v327_v4  }
  0xa7   : > { %v317_v9 = vpop.permute.xlu0 %316 }
  0xaa   : > { %v313_v14 = vpop.permute.xlu1 %312 }
  0xab   : > { %v315_v13 = vpop.permute.xlu0 %314 }
  0xac   : > { %v320_v16 = vsel %vm318_vm0, %v315_v13, %v317_v9  ;;  %v319_v17 = vsel %vm318_vm0, %v313_v14, %v315_v13 }
  0xad   : > { %630 = vmatprep.subr.msk.mxu0 %vm283_vm1, %v320_v16 }
  0xae   : > { %631 = vmatpush1.msk.msra.mxu0 %vm282_vm2, %v319_v17  ;;  %v298_v20 = vpop.permute.xlu1 %297 }
  0xaf   : > { %v300_v19 = vpop.permute.xlu0 %299  ;;  %374 = vmatprep.subr.mxu0 %v287_v2 }
  0xb0   : > { %v303_v21 = vsel %vm301_vm5, %v298_v20, %v300_v19  ;;  %375 = vmatpush1.msra.mxu0 %v286_v3 }
  0xb1   : > { %632 = vmatprep.subr.msk.mxu0 %vm951_vm6, %v303_v21 }
  0xb2   : > { %v296_v23 = vpop.permute.xlu1 %295 }
  0xb3   : > { %v302_v25 = vsel %vm301_vm5, %v296_v23, %v298_v20 }
  0xb4   : > { %633 = vmatpush1.msk.msra.mxu0 %vm958_vm9, %v302_v25 }
  0xb5   : > { %634 = vmatmul.mubr.msk.f32.vlgmr.msra.gmra.mxu0 %vm339_vm10, %v325_v24 }
  0xb6   : > { %416 = vmatprep.mubr.f32.mxu0 %v795_v0 }
  0xb9   : > { %635 = vmatmul.mubr.msk.f32.gmra.mxu0 %vm339_vm10, %v326_v30 }
  0xbc   : > { %v332_v26 = vpop.permute.xlu0 %331 }
 0x175   : > { %v412_v27 = vpop.f32.mrf.mxu0 }
 0x176   : > { %v413_v28 = vadd.f32 %v412_v27, %v332_v26 }
 0x177   : > { %v414_v29 = vpop.f32.mrf.mxu0 }
 0x178   : > { %v423_v31 = vmax.f32 %v413_v28, 0.0  ;;  %v415_v32 = vadd.f32 %v414_v29, %v332_v26 }
 0x179   : > { %v418_v45 = vpop.f32.mrf.mxu0 }
 0x17a   : > { %427 = vrot.lane.b32.xlu0 %v423_v31, %s798_s14  ;;  %437 = vrot.lane.b32.xlu1 %v423_v31, %s796_s12  ;;  %v424_v34 = vmax.f32 %v415_v32, 0.0 }
 0x17b   : > { %v420_v51 = vpop.f32.mrf.mxu0 }
 0x17e   : > { %451 = vperm.xlu0 %698, %v448_v33   ;;  %439 = vrot.lane.b32.xlu1 %v424_v34, %s796_s12  ;;  %s647_s12 = sshll.u32 %s851_s22, 8  ;;  %s799_s22 = smov [#allocation5]  }
 0x17f   : > { %s549_s26 = scalar_lea.hbm %s1039_s5, %s647_s12  ;;  %s732_s7 = sshll.u32 %s799_s22, 4  ;;  %s733_s7 = int_to_ptr.vmem [resolvable:$false] %s732_s7 }
 0x182   : > { %429 = vrot.lane.b32.xlu1 %v424_v34, %s798_s14  ;;  %s240_s14 = scalar_lea.vmem [#allocation5], %s628_s17  ;;  %s734_s17 = scalar_lea.vmem %s733_s7, 512 }
 0x183   : > { %s551_s29 = sshll.u32 %s240_s14, 4  ;;  %s552_s29 = int_to_ptr.vmem [resolvable:$true] %s551_s29 }
 0x184   : > { %s728_s8 = scalar_lea.vmem %s552_s29, 256  ;;  %p735_p3 = scmp.lt.s32.totalorder %s552_s29, %s733_s7 }
 0x185   : > { %p729_p11 = scmp.ne.s32.totalorder %s552_s29, %s728_s8  ;;  %p736_p5 = scmp.lt.s32.totalorder %s734_s17, %s728_s8 }
 0x186   : > { %336 = vperm.xlu1 %699, %v328_v35  }
 0x187   : > { %p730_p13 = pnand %p729_p11, %p1054_p12  ;;  %p737_p8 = por %p736_p5, %p735_p3 }
 0x189   : > { %p731_p1 = pneg %p730_p13 }
 0x18b   : > { %p738_p10 = pnand %p737_p8, %p731_p1 }
 0x1ec   : > { %v438_v36 = vpop.permute.xlu1 %437  ;;  %v428_v40 = vpop.permute.xlu0 %427 }
 0x1ed   : > { %v431_v44 = vsel %vm301_vm5, %v296_v23, %v428_v40 }
 0x1f0   : > { %v440_v37 = vpop.permute.xlu1 %439 }
 0x1f1   : > { %v442_v38 = vsel %vm318_vm0, %v440_v37, %v317_v9  ;;  %v441_v39 = vsel %vm318_vm0, %v438_v36, %v440_v37 }
 0x1f2   : > { %636 = vmatprep.subr.msk.mxu1 %vm283_vm1, %v442_v38 }
 0x1f3   : > { %637 = vmatpush1.msk.msra.mxu1 %vm282_vm2, %v441_v39 }
 0x1f4   : > { %485 = vmatprep.subr.mxu1 %v424_v34  ;;  %v430_v41 = vpop.permute.xlu1 %429 }
 0x1f5   : > { %v432_v42 = vsel %vm301_vm5, %v428_v40, %v430_v41  ;;  %486 = vmatpush1.msra.mxu1 %v423_v31 }
 0x1f6   : > { %638 = vmatprep.subr.msk.mxu1 %vm951_vm6, %v432_v42 }
 0x1f7   : > { %639 = vmatpush1.msk.msra.mxu1 %vm958_vm9, %v431_v44 }
 0x1f8   : > { %640 = vmatmul.mubr.msk.f32.vlgmr.msra.gmra.mxu1 %vm339_vm10, %v447_v43 }
 0x1f9   : > { %v452_v47 = vpop.permute.xlu0 %451 }
 0x201   : > { %v337_v46 = vpop.permute.xlu1 %336 }
 0x202   : > { %v419_v50 = vadd.f32 %v418_v45, %v337_v46  ;;  %v421_v56 = vadd.f32 %v420_v51, %v337_v46 }
 0x2b8   : > { %v523_v48 = vpop.f32.mrf.mxu1 }
 0x2b9   : > { %v524_v49 = vadd.f32 %v523_v48, %v452_v47 }
 0x2ba   : > { %v525_v52 = vpop.f32.mrf.mxu1 }
 0x2bb   : > { %v528_v53 = vmax.f32 %v524_v49, 0.0  ;;  %v526_v54 = vadd.f32 %v525_v52, %v452_v47 }
 0x2bd   : > { %v529_v55 = vmax.f32 %v526_v54, 0.0  ;;  %v530_v57 = vadd.f32 %v528_v53, %v419_v50 }
 0x2bf   : > { %v531_v58 = vadd.f32 %v529_v55, %v421_v56  ;;  %v532_v59 = vmax.f32 %v530_v57, 0.0 }
 0x2c1   : > { %v533_v60 = vmax.f32 %v531_v58, 0.0  ;;  %534 = vst [vmem:[%s240_s14] sm:$0xff] %v532_v59 }
 0x2c3   : > { %535 = vst [vmem:[%s240_s14 + $0x8] sm:$0xff] %v533_v60 }
 0x2c4   : > { %741 = shalt.err (!%p738_p10)
}
 0x2c5   : > { %s742_s9 = scalar_lea.hbm %s549_s26, 256  ;;  %s746_s11 = scalar_lea.hbm %s1039_s5, 512 }
 0x2c6   : > { %p743_p2 = scmp.ne.s32.totalorder %s549_s26, %s742_s9  ;;  %p747_p7 = scmp.lt.s32.totalorder %s549_s26, %s1039_s5 }
 0x2c7   : > { %p748_p0 = scmp.lt.s32.totalorder %s746_s11, %s742_s9 }
 0x2c8   : > { %p744_p4 = pnand %p743_p2, %p1054_p12 }
 0x2c9   : > { %p749_p6 = por %p748_p0, %p747_p7 }
 0x2ca   : > { %p745_p9 = pneg %p744_p4 }
 0x2cc   : > { %p750_p11 = pnand %p749_p6, %p745_p9 }
 0x2ce   : > { %753 = shalt.err (!%p750_p11)
}
 0x2cf   : > { %650 = dma.vmem_to_hbm [thread:$0]  (%p1054_p12), %s552_s29, 256, %s549_s26, %s537_s28  }
 0x2d0 PF: > { %s563_s12 = sand.u32 1, %s780_s18   ;;  %p1055_p13 = scmp.ne.s32.totalorder %s1045_s6, 0 }
 0x2d1   : > { %p1056_p1 = scmp.ge.s32.totalorder %s792_s21, 2  ;;  %s564_s14 = scalar_lea.sflag [#allocation4], %s563_s12 }
 0x2d3   : > { %p657_p3 = pnand %p1056_p1, %p1055_p13 }
 0x2d5   : > { %p658_p5 = pneg %p657_p3 }
 0x2d7   : > { %775 = dma.done.wait (%p658_p5), %s564_s14, 256  }
 0x2d8   : > { %777 = vsyncadd (%p658_p5), %s564_s14, 4294967040  ;;  %p18_p8 = scmp.ge.s32.totalorder %s855_s24, 4   ;;  %s1057_s18 = smov %s784_s19 }
 0x2d9   : > { %s1058_s19 = smov %s788_s20  ;;  %s1059_s20 = smov %s867_s27 }
 0x2da   : > { %s1060_s21 = smov %s855_s24  ;;  %20 = sbr.rel (!%p18_p8) target bundleno = 5 (0x5), region = 85 }
 0x2df   :  { %569 = vsyncpa [#allocation3], 1 }
 0x2e0   :  { %571 = vsyncpa [#allocation3 + $0x1], 1 }
 0x2e1   :  { %572 = vsyncpa [#allocation4], 1 }
 0x2e2   :  { %574 = vsyncpa [#allocation4 + $0x1], 1 }

</bundles_post_ra>
